<compile_context>
chip_gen: v7x
topology: tpu7x:2x2x1
jax: 0.10.0
libtpu: 0.0.40
codegen_flags: <defaults>
</compile_context>

<pallas_src>
import jax
import jax.numpy as jnp
from jax.experimental import pallas as pl
from jax.experimental.pallas import tpu as pltpu


LANES = 128               # vreg lane width; last dim of the lane-dense slab
MAX_TILE_ROWS = 4096      # 4096 x 128 f32 = 2 MiB/tile; in+out double-buffered ~= 8 MiB VMEM
SMALL_INPUT_ELEMS = 4096  # below this a Pallas launch is overhead-dominated -> plain XLA


def _linear_kernel(x_ref, w_ref, b_ref, o_ref):
    # x_ref / o_ref: (tile_rows, LANES) VMEM tiles; w_ref / b_ref: (1,) SMEM scalars.
    w = w_ref[0]
    b = b_ref[0]
    o_ref[...] = x_ref[...] * w + b   # scalar * vector FMA on the VPU; lane-dense store


def _round_up(v, m):
    return -(-v // m) * m


def ei_model_forward(x, weight, bias):
    """EIModel.forward: x (N, 1) f32 -> (N, 1) f32, computed as x * w + b."""
    n = x.shape[0]
    dtype = x.dtype
    total = x.size

    w = weight.reshape(1).astype(dtype)
    b = bias.reshape(1).astype(dtype)

    # Tiny inputs: fused XLA beats any kernel launch (per review).
    if total < SMALL_INPUT_ELEMS:
        return x * w[0] + b[0]

    flat = x.reshape(-1)                 # (N, 1) -> (N,): free
    rows = pl.cdiv(total, LANES)
    padded = rows * LANES
    if padded != total:
        # Ragged N: pad only the <128-element tail (not up to a tile multiple); the ragged
        # last row-block is handled by Pallas edge-block masking.
        flat = jnp.pad(flat, (0, padded - total))
    x2d = flat.reshape(rows, LANES)      # lane-dense slab; no copy when N % 128 == 0

    # Tile: as large as possible, but always >= 2 grid steps so the "parallel" axis can be
    # sharded across both TensorCores on v7x. rows >= 32 here, so the half-rows cap is a
    # multiple of 8 and strictly < rows.
    half_rows_cap = _round_up(_round_up(rows, 2) // 2, 8)
    tile_rows = min(MAX_TILE_ROWS, half_rows_cap)
    grid = (pl.cdiv(rows, tile_rows),)

    out2d = pl.pallas_call(
        _linear_kernel,
        out_shape=jax.ShapeDtypeStruct((rows, LANES), dtype),
        grid=grid,
        in_specs=[
            pl.BlockSpec((tile_rows, LANES), lambda i: (i, 0)),        # lane-dense input tile
            pl.BlockSpec(memory_space=pltpu.MemorySpace.SMEM),         # weight scalar
            pl.BlockSpec(memory_space=pltpu.MemorySpace.SMEM),         # bias scalar
        ],
        out_specs=pl.BlockSpec((tile_rows, LANES), lambda i: (i, 0)),  # lane-dense output tile
        compiler_params=pltpu.CompilerParams(
            dimension_semantics=("parallel",),     # elementwise; megacore-shardable
            vmem_limit_bytes=32 * 1024 * 1024,     # safe headroom on v5e/v6e/v7x
        ),
        cost_estimate=pl.CostEstimate(
            flops=2 * padded,                      # one mul + one add per element
            transcendentals=0,
            bytes_accessed=2 * padded * 4,         # one HBM read + one HBM write pass
        ),
        # NOTE: input_output_aliases={0: 0} is shape/dtype-compatible and would save the
        # output HBM allocation when the packed slab is a dead temp (ragged-N branch); it is
        # an allocator win only (no bandwidth change), so it is left off to keep the aligned
        # path alias-free for non-donated caller buffers.
    )(x2d, w, b)

    if padded == total:
        return out2d.reshape(n, 1)                 # no slice: reshape only
    return out2d.reshape(-1)[:total].reshape(n, 1)


if __name__ == "__main__":
    key = jax.random.PRNGKey(0)
    k1, k2, k3 = jax.random.split(key, 3)

    # Deterministic synthetic parameters (shapes from nn.Linear(1, 1)).
    weight = jnp.array([[0.37]], dtype=jnp.float32)   # (out_features=1, in_features=1)
    bias = jnp.array([-0.11], dtype=jnp.float32)      # (out_features=1,)

    # 1) Kernel path, ragged N: exercises the <128-element tail pad + edge-block masking.
    x_ragged = jax.random.normal(k1, (12421, 1), dtype=jnp.float32)
    out_ragged = ei_model_forward(x_ragged, weight, bias)

    # 2) Kernel path, lane-aligned N: no pad and no slice in the wrapper (reshape only).
    x_aligned = jax.random.normal(k2, (16384, 1), dtype=jnp.float32)
    out_aligned = ei_model_forward(x_aligned, weight, bias)

    # 3) Small-N fast path: plain fused XLA x*w + b.
    x_small = jax.random.normal(k3, (257, 1), dtype=jnp.float32)
    out_small = ei_model_forward(x_small, weight, bias)

    jax.block_until_ready((out_ragged, out_aligned, out_small))

    # Reference check in plain JAX (same semantics as torch's Linear forward).
    for x, out in ((x_ragged, out_ragged), (x_aligned, out_aligned), (x_small, out_small)):
        ref = x @ weight.T + bias
        assert out.shape == x.shape
        assert jnp.allclose(out, ref, atol=1e-6), "mismatch vs reference"

    print("KERNEL_OK")
</pallas_src>

<mosaic_0001>
module attributes {stable_mosaic.version = 11 : i64} {
  func.func @_linear_kernel(%arg0: i32, %arg1: memref<56x128xf32, #tpu.memory_space<vmem>>, %arg2: memref<1xf32, #tpu.memory_space<smem>>, %arg3: memref<1xf32, #tpu.memory_space<smem>>, %arg4: memref<56x128xf32, #tpu.memory_space<vmem>>) attributes {dimension_semantics = [#tpu.dimension_semantics<parallel>], iteration_bounds = array<i64: 2>, scalar_prefetch = 0 : i64, scratch_operands = 0 : i64, tpu.core_type = #tpu.core_type<tc>, window_params = [{transform_indices = @transform_0, window_bounds = array<i64: 56, 128>}, {transform_indices = @transform_1, window_bounds = array<i64: 1>}, {transform_indices = @transform_2, window_bounds = array<i64: 1>}, {transform_indices = @transform_3, window_bounds = array<i64: 56, 128>}]} {
    %c0 = arith.constant 0 : index
    %0 = memref.load %arg2[%c0] : memref<1xf32, #tpu.memory_space<smem>>
    %c0_0 = arith.constant 0 : index
    %1 = memref.load %arg3[%c0_0] : memref<1xf32, #tpu.memory_space<smem>>
    %c0_1 = arith.constant 0 : index
    %c0_2 = arith.constant 0 : index
    %2 = vector.load %arg1[%c0_1, %c0_2] : memref<56x128xf32, #tpu.memory_space<vmem>>, vector<56x128xf32>
    %3 = vector.broadcast %0 : f32 to vector<56x128xf32>
    %4 = arith.mulf %2, %3 : vector<56x128xf32>
    %5 = vector.broadcast %1 : f32 to vector<56x128xf32>
    %6 = arith.addf %4, %5 : vector<56x128xf32>
    %c0_3 = arith.constant 0 : index
    %c0_4 = arith.constant 0 : index
    %7 = vector.load %arg4[%c0_3, %c0_4] : memref<56x128xf32, #tpu.memory_space<vmem>>, vector<56x128xf32>
    tpu.vector_store %arg4[%c0_3, %c0_4], %6 {strides = array<i32>} : memref<56x128xf32, #tpu.memory_space<vmem>>, vector<56x128xf32>,
    return
  }
  func.func @transform_0(%arg0: i32) -> (i32, i32) {
    %c0_i32 = arith.constant 0 : i32
    %c0_i32_0 = arith.constant 0 : i32
    return %arg0, %c0_i32 : i32, i32
  }
  func.func @transform_1(%arg0: i32) -> i32 {
    %c0_i32 = arith.constant 0 : i32
    %c0_i32_0 = arith.constant 0 : i32
    return %c0_i32 : i32
  }
  func.func @transform_2(%arg0: i32) -> i32 {
    %c0_i32 = arith.constant 0 : i32
    %c0_i32_0 = arith.constant 0 : i32
    return %c0_i32 : i32
  }
  func.func @transform_3(%arg0: i32) -> (i32, i32) {
    %c0_i32 = arith.constant 0 : i32
    %c0_i32_0 = arith.constant 0 : i32
    return %arg0, %c0_i32 : i32, i32
  }
}

</mosaic_0001>

<bundles_post_ra>
// kernel: tpu_custom_call.1
= control target key start
LH: loop header
LB: loop body
LE: loop exit
PB: predicated region body
PF: predicated region fallthrough
CT: control target
= control target key end

     0   :  { %s693_s0 = inlined_call_operand.hbm [shape: f32[98,128], index: 0, kind: input, shape index: {}]   ;;  %s694_s1 = inlined_call_operand.<no memory space> [shape: f32[1], index: 1, kind: input, shape index: {}]   ;;  %s695_s2 = inlined_call_operand.<no memory space> [shape: f32[1], index: 2, kind: input, shape index: {}]   ;;  %s696_s3 = inlined_call_operand.hbm [shape: f32[98,128], index: 3, kind: output, shape index: {}]  }
   0x1   :  { %8 = sst [smem:[#allocation2]] %s694_s1 }
   0x2   :  { %9 = sst [smem:[#allocation3]] %s695_s2 }
   0x3   :  { %10 = vsyncpa [#allocation5], 0 }
   0x4   :  { %12 = vsyncpa [#allocation5 + $0x1], 0 }
   0x5   :  { %13 = vsyncpa [#allocation6], 0 }
   0x6   :  { %15 = vsyncpa [#allocation6 + $0x1], 0  ;;  %s523_s16 = smov 0   ;;  %s525_s17 = smov 0  }
   0x7   :  { %s527_s18 = smov 0   ;;  %s529_s19 = smov 0  }
   0x8 LB: > { %s544_s1 = sadd.s32 4294967295, %s489_s19   ;;  %s332_s2 = sadd.s32 4294967294, %s489_s19   ;;  %s489_s19 = sphi %s529_s19, %s706_s19   ;;  %s485_s18 = sphi %s527_s18, %s705_s18   ;;  %s481_s17 = sphi %s525_s17, %s704_s17   ;;  %s477_s16 = sphi %s523_s16, %s703_s16  }
   0x9   : > { %s548_s20 = sadd.s32 1, %s489_s19   ;;  %s28_s21 = sadd.s32 1, %s485_s18 }
   0xa   : > { %s25_s22 = ssub.s32 %s489_s19, %s548_s20  ;;  %p35_p0 = scmp.ne.s32.totalorder %s485_s18, %s481_s17 }
   0xb   : > { %p26_p1 = scmp.eq.s32.totalorder %s25_s22, 0  ;;  %p36_p2 = scmp.eq.s32.totalorder %s489_s19, 0 }
   0xc   : > { %p41_p3 = scmp.ne.s32.totalorder %s481_s17, %s477_s16  ;;  %p42_p4 = scmp.eq.s32.totalorder %s544_s1, 0 }
   0xd   : > { %s560_s23 = scalar_select %p26_p1, %s485_s18, %s28_s21  }
   0xe   : > { %p37_p5 = por %p36_p2, %p35_p0  ;;  %p562_p6 = por %p42_p4, %p41_p3 }
   0xf   : > { %p107_p7 = scmp.eq.s32.totalorder %s544_s1, 1  ;;  %p113_p8 = scmp.eq.s32.totalorder %s332_s2, 1 }
  0x10   : > { %p697_p11 = scmp.ge.s32.totalorder %s489_s19, 2 }
  0x11   : > { %p567_p9 = por %p107_p7, %p35_p0  ;;  %p571_p10 = por %p113_p8, %p41_p3 }
  0x12   : > { %135 = sbr.rel (%p697_p11) target bundleno = 60 (0x3c), region = 24 }
  0x13   : > { %s700_s26 = scalar_select %p571_p10, 1, 0 }
  0x19   : > { %138 = sbr.rel (!%p37_p5) target bundleno = 60 (0x3c), region = 28  ;;  %s139_s27 = sand.u32 (%p37_p5), 1, %s485_s18  }
  0x1a   : > { %s144_s28 = smul.u32 (%p37_p5), 7, %s489_s19  ;;  %s583_s6 = scalar_lea.sflag (%p37_p5), [#allocation5], %s139_s27 }
  0x1b   : > { %s350_s29 = smul.u32 (%p37_p5), 56, %s139_s27 }
  0x1c   : > { %s145_s30 = ssub.s32 (%p37_p5), 13, %s144_s28 }
  0x1d   : > { %p146_p12 = scmp.lt.s32.totalorder (%p37_p5), %s145_s30, 7  ;;  %s143_s7 = scalar_lea.vmem (%p37_p5), [#allocation4], %s350_s29 }
  0x20   : > { %s708_s30 = smov (!%p146_p12, %s145_s30), 7 }
  0x21   : > { %s580_s4 = sshll.u32 %s708_s30, 7 }
  0x22   : > { %s150_s5 = ssub.s32 896, %s580_s4 }
  0x23   : > { %151 = vsyncadd %s583_s6, %s150_s5  ;;  %p336_p13 = scmp.ne.s32.totalorder %s580_s4, 0  ;;  %s348_s8 = smul.u32 896, %s489_s19 }
  0x24   : > { %s156_s9 = sshll.u32 %s143_s7, 4  ;;  %s399_s2 = scalar_lea.hbm %s693_s0, 1664  ;;  %s593_s9 = int_to_ptr.vmem [resolvable:$true] %s156_s9 }
  0x25   : > { %s591_s12 = scalar_lea.hbm %s693_s0, %s348_s8 }
  0x26   : > { %s395_s13 = scalar_lea.hbm %s591_s12, %s580_s4  ;;  %p400_p3 = scmp.lt.u32.totalorder %s591_s12, %s693_s0 }
  0x27   : > { %p396_p0 = scmp.ne.s32.totalorder %s591_s12, %s395_s13  ;;  %p401_p4 = scmp.lt.u32.totalorder %s399_s2, %s395_s13 }
  0x28   : > { %p403_p7 = scmp.lt.u32.totalorder %s395_s13, %s591_s12 }
  0x29   : > { %p397_p1 = pnand %p396_p0, %p336_p13  ;;  %p402_p5 = por %p401_p4, %p400_p3 }
  0x2b   : > { %p398_p2 = pneg %p397_p1  ;;  %p404_p8 = por %p403_p7, %p402_p5 }
  0x2d   : > { %p405_p12 = pnand %p404_p8, %p398_p2 }
  0x2f   : > { %408 = shalt.err (!%p405_p12)
}
  0x30   : > { %s409_s27 = scalar_lea.vmem %s593_s9, %s580_s4  ;;  %s491_s28 = smov [#allocation4]  }
  0x31   : > { %p410_p0 = scmp.ne.s32.totalorder %s593_s9, %s409_s27  ;;  %s413_s29 = sshll.u32 %s491_s28, 4  ;;  %s414_s29 = int_to_ptr.vmem [resolvable:$false] %s413_s29 }
  0x32   : > { %s415_s30 = scalar_lea.vmem %s414_s29, 1792  ;;  %p416_p10 = scmp.lt.s32.totalorder %s593_s9, %s414_s29 }
  0x33   : > { %p411_p1 = pnand %p410_p0, %p336_p13  ;;  %p417_p3 = scmp.lt.s32.totalorder %s415_s30, %s409_s27 }
  0x35   : > { %p412_p11 = pneg %p411_p1  ;;  %p418_p4 = por %p417_p3, %p416_p10 }
  0x37   : > { %p419_p5 = pnand %p418_p4, %p412_p11 }
  0x39   : > { %422 = shalt.err (!%p419_p5)
}
  0x3a   : > { %s492_s5 = smov 128   ;;  %s493_s7 = smov 8  }
  0x3b   : > { %162 = dma.hbm_to_vmem [thread:$0]  (%p336_p13), %s591_s12, %s580_s4, %s593_s9, %s583_s6, %s492_s5, %s492_s5, %s493_s7  }
  0x3c PF: > { %p340_p2 = scmp.ge.s32.totalorder %s489_s19, 1  ;;  %p164_p7 = scmp.lt.s32.totalorder %s489_s19, 3 }
  0x3e   : > { %p165_p8 = pnand %p340_p2, %p164_p7 }
  0x3f   : > { %s623_s8 = sand.u32 (!%p165_p8), 1, %s481_s17  }
  0x40   : > { %168 = sbr.rel (%p165_p8) target bundleno = 115 (0x73), region = 32  ;;  %s171_s11 = scalar_lea.sflag (!%p165_p8), [#allocation5], %s623_s8 }
  0x41   : > { %s351_s10 = smul.u32 (!%p165_p8), 56, %s623_s8 }
  0x43   : > { %s174_s13 = scalar_lea.vmem (!%p165_p8), [#allocation4], %s351_s10 }
  0x47   : > { %468 = dma.done.wait (%p562_p6), %s171_s11, 896  }
  0x48   : > { %470 = vsyncadd (%p562_p6), %s171_s11, 4294966400  ;;  %s207_s4 = sld [smem:[#allocation2]]  ;;  %v209_v0 = vld [vmem:[%s174_s13] sm:$0xff]  ;;  %v210_v3 = vld [vmem:[%s174_s13 + $0x8] sm:$0xff]  ;;  %s196_s24 = scalar_lea.vmem [#allocation7], %s351_s10 }
  0x49   : > { %s208_s6 = sld [smem:[#allocation3]]  ;;  %v211_v6 = vld [vmem:[%s174_s13 + $0x10] sm:$0xff]  ;;  %v212_v7 = vld [vmem:[%s174_s13 + $0x18] sm:$0xff]  ;;  %v213_v8 = vld [vmem:[%s174_s13 + $0x20] sm:$0xff]  ;;  %s240_s9 = scalar_lea.sflag [#allocation6], %s623_s8 }
  0x4a   : > { %v214_v12 = vld [vmem:[%s174_s13 + $0x28] sm:$0xff]  ;;  %v215_v13 = vld [vmem:[%s174_s13 + $0x30] sm:$0xff]  ;;  %s247_s12 = smul.u32 (%p567_p9), 7, %s544_s1 }
  0x4c   : > { %s248_s14 = ssub.s32 (%p567_p9), 13, %s247_s12 }
  0x4d   : > { %p249_p6 = scmp.lt.s32.totalorder (%p567_p9), %s248_s14, 7 }
  0x4e   : > { %v216_v1 = vstv %s207_s4 }
  0x4f   : > { %v224_v2 = vstv %s208_s6  ;;  %v217_v4 = vmul.f32 %v216_v1, %v209_v0  ;;  %v218_v5 = vmul.f32 %v216_v1, %v210_v3  ;;  %v219_v9 = vmul.f32 %v216_v1, %v211_v6 }
  0x50   : > { %v220_v10 = vmul.f32 %v216_v1, %v212_v7  ;;  %v221_v11 = vmul.f32 %v216_v1, %v213_v8  ;;  %v222_v16 = vmul.f32 %v216_v1, %v214_v12  ;;  %v223_v17 = vmul.f32 %v216_v1, %v215_v13  ;;  %246 = sbr.rel (!%p567_p9) target bundleno = 115 (0x73), region = 40 }
  0x51   : > { %v225_v14 = vadd.f32 %v224_v2, %v217_v4  ;;  %v226_v15 = vadd.f32 %v224_v2, %v218_v5  ;;  %v227_v18 = vadd.f32 %v224_v2, %v219_v9 }
  0x52   : > { %v228_v19 = vadd.f32 %v224_v2, %v220_v10  ;;  %v229_v20 = vadd.f32 %v224_v2, %v221_v11  ;;  %v230_v21 = vadd.f32 %v224_v2, %v222_v16  ;;  %v231_v22 = vadd.f32 %v224_v2, %v223_v17 }
  0x53   : > { %232 = vst [vmem:[%s196_s24] sm:$0xff] %v225_v14  ;;  %233 = vst [vmem:[%s196_s24 + $0x8] sm:$0xff] %v226_v15 }
  0x54   : > { %234 = vst [vmem:[%s196_s24 + $0x10] sm:$0xff] %v227_v18  ;;  %235 = vst [vmem:[%s196_s24 + $0x18] sm:$0xff] %v228_v19 }
  0x55   : > { %236 = vst [vmem:[%s196_s24 + $0x20] sm:$0xff] %v229_v20  ;;  %237 = vst [vmem:[%s196_s24 + $0x28] sm:$0xff] %v230_v21 }
  0x56   : > { %238 = vst [vmem:[%s196_s24 + $0x30] sm:$0xff] %v231_v22 }
  0x57   : > { %s710_s14 = smov (!%p249_p6, %s248_s14), 7 }
  0x58   : > { %s635_s15 = sshll.u32 %s710_s14, 7 }
  0x59   : > { %s253_s2 = ssub.s32 896, %s635_s15 }
  0x5a   : > { %254 = vsyncadd %s240_s9, %s253_s2  ;;  %p342_p10 = scmp.ne.s32.totalorder %s635_s15, 0  ;;  %s349_s21 = smul.u32 896, %s544_s1 }
  0x5b   : > { %s259_s25 = sshll.u32 %s196_s24, 4  ;;  %s494_s30 = smov [#allocation7]   ;;  %s647_s25 = int_to_ptr.vmem [resolvable:$true] %s259_s25 }
  0x5c   : > { %s645_s28 = scalar_lea.hbm %s696_s3, %s349_s21  ;;  %s423_s29 = scalar_lea.vmem %s647_s25, %s635_s15 }
  0x5d   : > { %p424_p9 = scmp.ne.s32.totalorder %s647_s25, %s423_s29  ;;  %s427_s5 = sshll.u32 %s494_s30, 4  ;;  %s428_s5 = int_to_ptr.vmem [resolvable:$false] %s427_s5 }
  0x5e   : > { %s429_s1 = scalar_lea.vmem %s428_s5, 1792  ;;  %p430_p12 = scmp.lt.s32.totalorder %s647_s25, %s428_s5 }
  0x5f   : > { %p425_p11 = pnand %p424_p9, %p342_p10  ;;  %p431_p0 = scmp.lt.s32.totalorder %s429_s1, %s423_s29 }
  0x61   : > { %p426_p13 = pneg %p425_p11  ;;  %p432_p1 = por %p431_p0, %p430_p12 }
  0x63   : > { %p433_p3 = pnand %p432_p1, %p426_p13 }
  0x65   : > { %436 = shalt.err (!%p433_p3)
}
  0x66   : > { %s437_s7 = scalar_lea.hbm %s645_s28, %s635_s15  ;;  %s441_s13 = scalar_lea.hbm %s696_s3, 1664 }
  0x67   : > { %p438_p4 = scmp.ne.s32.totalorder %s645_s28, %s437_s7  ;;  %p442_p7 = scmp.lt.u32.totalorder %s645_s28, %s696_s3 }
  0x68   : > { %p443_p8 = scmp.lt.u32.totalorder %s441_s13, %s437_s7  ;;  %p445_p9 = scmp.lt.u32.totalorder %s437_s7, %s645_s28 }
  0x69   : > { %p439_p5 = pnand %p438_p4, %p342_p10 }
  0x6a   : > { %p444_p6 = por %p443_p8, %p442_p7 }
  0x6b   : > { %p440_p2 = pneg %p439_p5 }
  0x6c   : > { %p446_p11 = por %p445_p9, %p444_p6 }
  0x6e   : > { %p447_p13 = pnand %p446_p11, %p440_p2 }
  0x70   : > { %450 = shalt.err (!%p447_p13)
}
  0x71   : > { %s495_s24 = smov 128   ;;  %s496_s12 = smov 8  }
  0x72   : > { %265 = dma.vmem_to_hbm [thread:$0]  (%p342_p10), %s647_s25, %s635_s15, %s645_s28, %s240_s9, %s495_s24, %s495_s24, %s496_s12  }
  0x73 PF: > { %s274_s14 = sand.u32 1, %s477_s16   ;;  %p701_p12 = scmp.ne.s32.totalorder %s700_s26, 0 }
  0x74   : > { %p702_p0 = scmp.ge.s32.totalorder %s489_s19, 2  ;;  %s275_s2 = scalar_lea.sflag [#allocation6], %s274_s14 }
  0x76   : > { %p355_p1 = pnand %p702_p0, %p701_p12 }
  0x78   : > { %472 = dma.done.wait (!%p355_p1), %s275_s2, 896  }
  0x79   : > { %474 = vsyncadd (!%p355_p1), %s275_s2, 4294966400  ;;  %p18_p3 = scmp.ge.s32.totalorder %s548_s20, 4   ;;  %s703_s16 = smov %s481_s17 }
  0x7a   : > { %s704_s17 = smov %s485_s18  ;;  %s705_s18 = smov %s560_s23 }
  0x7b   : > { %s706_s19 = smov %s548_s20  ;;  %20 = sbr.rel (!%p18_p3) target bundleno = 8 (0x8), region = 77 }
  0x82   :  { %280 = vsyncpa [#allocation5], 1 }
  0x83   :  { %282 = vsyncpa [#allocation5 + $0x1], 1 }
  0x84   :  { %283 = vsyncpa [#allocation6], 1 }
  0x85   :  { %285 = vsyncpa [#allocation6 + $0x1], 1 }

</bundles_post_ra>
